<compile_context>
chip_gen: v7x
topology: tpu7x:2x2x1
jax: 0.10.0
libtpu: 0.0.40
codegen_flags: <defaults>
</compile_context>

<pallas_src>
import jax
import jax.numpy as jnp
from jax.experimental import pallas as pl
from jax.experimental.pallas import tpu as pltpu


def _leaky_relu(x, slope=0.001):
    return jnp.where(x >= 0, x, slope * x)


def policy_kernel(x_ref, w1_ref, b1_ref, w2_ref, b2_ref, wh_ref, bh_ref,
                  out_ref):
    """One batch-tile of the full MLP. Heads are fused into wh/bh (lane-dense)."""
    x = x_ref[...]                                              # (TB, S)

    # Layer 1: Linear + leaky_relu(0.001)
    h1 = jnp.dot(x, w1_ref[...], preferred_element_type=jnp.float32) + b1_ref[...]
    h1 = _leaky_relu(h1)

    # Layer 2: Linear + leaky_relu(0.001)
    h2 = jnp.dot(h1, w2_ref[...], preferred_element_type=jnp.float32) + b2_ref[...]
    h2 = _leaky_relu(h2)

    # Fused heads: one matmul, one lane-dense (TB, 128) store.
    out = jnp.dot(h2, wh_ref[...], preferred_element_type=jnp.float32) + bh_ref[...]
    out_ref[...] = out.astype(out_ref.dtype)


def _round_up(n, m):
    return pl.cdiv(n, m) * m


def policy_forward(x, params, *, tb=256):
    """Run the policy MLP as a batch-tiled Pallas kernel. Returns (x_m, x_v)."""
    w1, b1, w2, b2, wm, bm, wv, bv = params
    B, S = x.shape
    H = w1.shape[1]
    A = wm.shape[1]

    # --- Fuse the two heads into one lane-dense weight / bias ---------------
    head_width = 2 * A
    head_pad = max(128, _round_up(head_width, 128))            # lane-dense output
    wh = jnp.zeros((H, head_pad), jnp.float32).at[:, :head_width].set(
        jnp.concatenate([wm, wv], axis=1))
    bh = jnp.zeros((1, head_pad), jnp.float32).at[:, :head_width].set(
        jnp.concatenate([bm, bv], axis=1))

    # --- Batch tiling --------------------------------------------------------
    tb = min(tb, _round_up(B, 8))                              # f32: sublane multiple of 8
    b_pad = _round_up(B, tb)
    if b_pad != B:
        x = jnp.pad(x, ((0, b_pad - B), (0, 0)))
    grid = (b_pad // tb,)

    # Weights: full-array blocks with constant index_map -> VMEM-resident.
    def full_w(arr):
        nd = arr.ndim
        return pl.BlockSpec(arr.shape, lambda i, _nd=nd: (0,) * _nd)

    out = pl.pallas_call(
        policy_kernel,
        out_shape=jax.ShapeDtypeStruct((b_pad, head_pad), jnp.float32),
        grid=grid,
        in_specs=[
            pl.BlockSpec((tb, S), lambda i: (i, 0)),           # x: tiled on batch
            full_w(w1), full_w(b1), full_w(w2), full_w(b2),
            full_w(wh), full_w(bh),
        ],
        out_specs=pl.BlockSpec((tb, head_pad), lambda i: (i, 0)),
        compiler_params=pltpu.CompilerParams(
            dimension_semantics=("parallel",)),                # v7x: split batch over 2 TCs
    )(x, w1, b1, w2, b2, wh, bh)

    out = out[:B]
    return out[:, :A], out[:, A:head_width]


def init_params(key, state_dim, hidden_dim, action_dim):
    """Deterministic synthetic init mimicking nn.Linear's uniform(-1/sqrt(fan_in), ...)."""
    def linear(k, fan_in, fan_out):
        kw, kb = jax.random.split(k)
        bound = 1.0 / jnp.sqrt(fan_in)
        # Stored as (in, out) so the kernel can do x @ W.
        w = jax.random.uniform(kw, (fan_in, fan_out), jnp.float32, -bound, bound)
        b = jax.random.uniform(kb, (1, fan_out), jnp.float32, -bound, bound)
        return w, b

    k1, k2, k3, k4 = jax.random.split(key, 4)
    w1, b1 = linear(k1, state_dim, hidden_dim)
    w2, b2 = linear(k2, hidden_dim, hidden_dim)
    wm, bm = linear(k3, hidden_dim, action_dim)
    wv, bv = linear(k4, hidden_dim, action_dim)
    return (w1, b1, w2, b2, wm, bm, wv, bv)


def reference_forward(x, params):
    """Pure-JAX reference for correctness check."""
    w1, b1, w2, b2, wm, bm, wv, bv = params
    h = _leaky_relu(x @ w1 + b1)
    h = _leaky_relu(h @ w2 + b2)
    return h @ wm + bm, h @ wv + bv


if __name__ == "__main__":
    state_dim, hidden_dim, action_dim = 16, 32, 8
    batch = 8

    key = jax.random.PRNGKey(0)
    kx, kp = jax.random.split(key)
    x = jax.random.normal(kx, (batch, state_dim), jnp.float32)
    params = init_params(kp, state_dim, hidden_dim, action_dim)

    x_m, x_v = policy_forward(x, params)
    jax.block_until_ready((x_m, x_v))

    ref_m, ref_v = reference_forward(x, params)
    assert x_m.shape == ref_m.shape and x_v.shape == ref_v.shape
    assert jnp.allclose(x_m, ref_m, atol=1e-5, rtol=1e-5)
    assert jnp.allclose(x_v, ref_v, atol=1e-5, rtol=1e-5)

    print("KERNEL_OK")
</pallas_src>

<mosaic_0001>
module attributes {stable_mosaic.version = 11 : i64} {
  func.func @policy_kernel(%arg0: i32, %arg1: memref<8x16xf32, #tpu.memory_space<vmem>>, %arg2: memref<16x32xf32, #tpu.memory_space<vmem>>, %arg3: memref<1x32xf32, #tpu.memory_space<vmem>>, %arg4: memref<32x32xf32, #tpu.memory_space<vmem>>, %arg5: memref<1x32xf32, #tpu.memory_space<vmem>>, %arg6: memref<32x128xf32, #tpu.memory_space<vmem>>, %arg7: memref<1x128xf32, #tpu.memory_space<vmem>>, %arg8: memref<8x128xf32, #tpu.memory_space<vmem>>) attributes {dimension_semantics = [#tpu.dimension_semantics<parallel>], iteration_bounds = array<i64: 1>, scalar_prefetch = 0 : i64, scratch_operands = 0 : i64, tpu.core_type = #tpu.core_type<tc>, window_params = [{transform_indices = @transform_0, window_bounds = array<i64: 8, 16>}, {pipeline_mode = #tpu.pipeline_mode<synchronous>, transform_indices = @transform_1, window_bounds = array<i64: 16, 32>}, {pipeline_mode = #tpu.pipeline_mode<synchronous>, transform_indices = @transform_2, window_bounds = array<i64: 1, 32>}, {pipeline_mode = #tpu.pipeline_mode<synchronous>, transform_indices = @transform_3, window_bounds = array<i64: 32, 32>}, {pipeline_mode = #tpu.pipeline_mode<synchronous>, transform_indices = @transform_4, window_bounds = array<i64: 1, 32>}, {pipeline_mode = #tpu.pipeline_mode<synchronous>, transform_indices = @transform_5, window_bounds = array<i64: 32, 128>}, {pipeline_mode = #tpu.pipeline_mode<synchronous>, transform_indices = @transform_6, window_bounds = array<i64: 1, 128>}, {transform_indices = @transform_7, window_bounds = array<i64: 8, 128>}]} {
    %c0 = arith.constant 0 : index
    %c0_0 = arith.constant 0 : index
    %0 = vector.load %arg1[%c0, %c0_0] : memref<8x16xf32, #tpu.memory_space<vmem>>, vector<8x16xf32>
    %c0_1 = arith.constant 0 : index
    %c0_2 = arith.constant 0 : index
    %1 = vector.load %arg2[%c0_1, %c0_2] : memref<16x32xf32, #tpu.memory_space<vmem>>, vector<16x32xf32>
    %cst = arith.constant dense<0.000000e+00> : vector<8x32xf32>
    %2 = tpu.matmul %0, %1, %cst {dimension_numbers = #tpu.dot_dimension_numbers<[1], [0], [0], [1], [0, 0, 1, 1], [], []>} : vector<8x16xf32>, vector<16x32xf32>, vector<8x32xf32> -> vector<8x32xf32>
    %c0_3 = arith.constant 0 : index
    %c0_4 = arith.constant 0 : index
    %3 = vector.load %arg3[%c0_3, %c0_4] : memref<1x32xf32, #tpu.memory_space<vmem>>, vector<1x32xf32>
    %4 = vector.broadcast %3 : vector<1x32xf32> to vector<8x32xf32>
    %5 = arith.addf %2, %4 : vector<8x32xf32>
    %cst_5 = arith.constant 0.000000e+00 : f32
    %6 = vector.broadcast %cst_5 : f32 to vector<8x32xf32>
    %7 = arith.cmpf oge, %5, %6 : vector<8x32xf32>
    %cst_6 = arith.constant 1.000000e-03 : f32
    %8 = vector.broadcast %cst_6 : f32 to vector<8x32xf32>
    %9 = arith.mulf %8, %5 : vector<8x32xf32>
    %10 = arith.select %7, %5, %9 : vector<8x32xi1>, vector<8x32xf32>
    %c0_7 = arith.constant 0 : index
    %c0_8 = arith.constant 0 : index
    %11 = vector.load %arg4[%c0_7, %c0_8] : memref<32x32xf32, #tpu.memory_space<vmem>>, vector<32x32xf32>
    %cst_9 = arith.constant dense<0.000000e+00> : vector<8x32xf32>
    %12 = tpu.matmul %10, %11, %cst_9 {dimension_numbers = #tpu.dot_dimension_numbers<[1], [0], [0], [1], [0, 0, 1, 1], [], []>} : vector<8x32xf32>, vector<32x32xf32>, vector<8x32xf32> -> vector<8x32xf32>
    %c0_10 = arith.constant 0 : index
    %c0_11 = arith.constant 0 : index
    %13 = vector.load %arg5[%c0_10, %c0_11] : memref<1x32xf32, #tpu.memory_space<vmem>>, vector<1x32xf32>
    %14 = vector.broadcast %13 : vector<1x32xf32> to vector<8x32xf32>
    %15 = arith.addf %12, %14 : vector<8x32xf32>
    %cst_12 = arith.constant 0.000000e+00 : f32
    %16 = vector.broadcast %cst_12 : f32 to vector<8x32xf32>
    %17 = arith.cmpf oge, %15, %16 : vector<8x32xf32>
    %cst_13 = arith.constant 1.000000e-03 : f32
    %18 = vector.broadcast %cst_13 : f32 to vector<8x32xf32>
    %19 = arith.mulf %18, %15 : vector<8x32xf32>
    %20 = arith.select %17, %15, %19 : vector<8x32xi1>, vector<8x32xf32>
    %c0_14 = arith.constant 0 : index
    %c0_15 = arith.constant 0 : index
    %21 = vector.load %arg6[%c0_14, %c0_15] : memref<32x128xf32, #tpu.memory_space<vmem>>, vector<32x128xf32>
    %cst_16 = arith.constant dense<0.000000e+00> : vector<8x128xf32>
    %22 = tpu.matmul %20, %21, %cst_16 {dimension_numbers = #tpu.dot_dimension_numbers<[1], [0], [0], [1], [0, 0, 1, 1], [], []>} : vector<8x32xf32>, vector<32x128xf32>, vector<8x128xf32> -> vector<8x128xf32>
    %c0_17 = arith.constant 0 : index
    %c0_18 = arith.constant 0 : index
    %23 = vector.load %arg7[%c0_17, %c0_18] : memref<1x128xf32, #tpu.memory_space<vmem>>, vector<1x128xf32>
    %24 = vector.broadcast %23 : vector<1x128xf32> to vector<8x128xf32>
    %25 = arith.addf %22, %24 : vector<8x128xf32>
    %c0_19 = arith.constant 0 : index
    %c0_20 = arith.constant 0 : index
    %26 = vector.load %arg8[%c0_19, %c0_20] : memref<8x128xf32, #tpu.memory_space<vmem>>, vector<8x128xf32>
    tpu.vector_store %arg8[%c0_19, %c0_20], %25 {strides = array<i32>} : memref<8x128xf32, #tpu.memory_space<vmem>>, vector<8x128xf32>,
    return
  }
  func.func @transform_0(%arg0: i32) -> (i32, i32) {
    %c0_i32 = arith.constant 0 : i32
    %c0_i32_0 = arith.constant 0 : i32
    return %arg0, %c0_i32 : i32, i32
  }
  func.func @transform_1(%arg0: i32) -> (i32, i32) {
    %c0_i32 = arith.constant 0 : i32
    %c0_i32_0 = arith.constant 0 : i32
    %c0_i32_1 = arith.constant 0 : i32
    return %c0_i32, %c0_i32_0 : i32, i32
  }
  func.func @transform_2(%arg0: i32) -> (i32, i32) {
    %c0_i32 = arith.constant 0 : i32
    %c0_i32_0 = arith.constant 0 : i32
    %c0_i32_1 = arith.constant 0 : i32
    return %c0_i32, %c0_i32_0 : i32, i32
  }
  func.func @transform_3(%arg0: i32) -> (i32, i32) {
    %c0_i32 = arith.constant 0 : i32
    %c0_i32_0 = arith.constant 0 : i32
    %c0_i32_1 = arith.constant 0 : i32
    return %c0_i32, %c0_i32_0 : i32, i32
  }
  func.func @transform_4(%arg0: i32) -> (i32, i32) {
    %c0_i32 = arith.constant 0 : i32
    %c0_i32_0 = arith.constant 0 : i32
    %c0_i32_1 = arith.constant 0 : i32
    return %c0_i32, %c0_i32_0 : i32, i32
  }
  func.func @transform_5(%arg0: i32) -> (i32, i32) {
    %c0_i32 = arith.constant 0 : i32
    %c0_i32_0 = arith.constant 0 : i32
    %c0_i32_1 = arith.constant 0 : i32
    return %c0_i32, %c0_i32_0 : i32, i32
  }
  func.func @transform_6(%arg0: i32) -> (i32, i32) {
    %c0_i32 = arith.constant 0 : i32
    %c0_i32_0 = arith.constant 0 : i32
    %c0_i32_1 = arith.constant 0 : i32
    return %c0_i32, %c0_i32_0 : i32, i32
  }
  func.func @transform_7(%arg0: i32) -> (i32, i32) {
    %c0_i32 = arith.constant 0 : i32
    %c0_i32_0 = arith.constant 0 : i32
    return %arg0, %c0_i32 : i32, i32
  }
}

</mosaic_0001>

<bundles_post_ra>
// kernel: tpu_custom_call.1
= control target key start
LH: loop header
LB: loop body
LE: loop exit
PB: predicated region body
PF: predicated region fallthrough
CT: control target
= control target key end

     0   :  { %12 = vsyncpa [#allocation3], 0  ;;  %s679_s0 = inlined_call_operand.hbm [shape: f32[8,16], index: 0, kind: input, shape index: {}]   ;;  %s680_s1 = inlined_call_operand.hbm [shape: f32[16,32], index: 1, kind: input, shape index: {}]   ;;  %s681_s2 = inlined_call_operand.vmem [shape: f32[1,32], index: 2, kind: input, shape index: {}]   ;;  %s682_s3 = inlined_call_operand.hbm [shape: f32[32,32], index: 3, kind: input, shape index: {}]   ;;  %s683_s4 = inlined_call_operand.vmem [shape: f32[1,32], index: 4, kind: input, shape index: {}]   ;;  %s684_s5 = inlined_call_operand.hbm [shape: f32[32,128], index: 5, kind: input, shape index: {}]   ;;  %s685_s6 = inlined_call_operand.vmem [shape: f32[1,128], index: 6, kind: input, shape index: {}]   ;;  %s686_s7 = inlined_call_operand.hbm [shape: f32[8,128], index: 7, kind: output, shape index: {}]  }
   0x1   :  { %13 = vsyncpa [#allocation6], 0 }
   0x2   :  { %14 = vsyncpa [#allocation9], 0 }
   0x3   :  { %15 = vsyncpa [#allocation4], 0  ;;  %s548_s24 = smov [#allocation5]   ;;  %s430_s28 = scalar_lea.hbm %s680_s1, 256 }
   0x4   :  { %s31_s25 = sshll.u32 %s548_s24, 4  ;;  %p431_p0 = scmp.ne.s32.totalorder %s680_s1, %s430_s28  ;;  %s32_s25 = int_to_ptr.vmem [resolvable:$true] %s31_s25 }
   0x5   :  { %p434_p1 = scmp.lt.u32.totalorder %s430_s28, %s680_s1 }
   0x7   :  { %p436_p2 = pnand %p434_p1, %p431_p0 }
   0x9   :  { %439 = shalt.err (!%p436_p2)
}
   0xa   :  { %s440_s10 = scalar_lea.vmem %s32_s25, 256  ;;  %p445_p4 = scmp.lt.s32.totalorder %s32_s25, %s32_s25 }
   0xb   :  { %p441_p3 = scmp.ne.s32.totalorder %s32_s25, %s440_s10  ;;  %p446_p5 = scmp.lt.s32.totalorder %s440_s10, %s440_s10 }
   0xd   :  { %p447_p6 = por %p446_p5, %p445_p4 }
   0xf   :  { %p448_p7 = pnand %p447_p6, %p441_p3 }
  0x11   :  { %451 = shalt.err (!%p448_p7)
}
  0x12   :  { %s549_s11 = smov 128   ;;  %s550_s12 = smov 8  }
  0x13   :  { %37 = dma.hbm_to_vmem [thread:$0]  %s680_s1, 256, %s32_s25, [#allocation6], %s549_s11, %s549_s11, %s550_s12  }
  0x14   :  { %s551_s15 = smov [#allocation2]   ;;  %s552_s17 = smov [#allocation7]  }
  0x15   :  { %s22_s16 = sshll.u32 %s551_s15, 4  ;;  %s45_s18 = sshll.u32 %s552_s17, 4  ;;  %s23_s16 = int_to_ptr.vmem [resolvable:$true] %s22_s16  ;;  %s46_s18 = int_to_ptr.vmem [resolvable:$true] %s45_s18 }
  0x16   :  { %s452_s21 = scalar_lea.hbm %s679_s0, 128 }
  0x17   :  { %p453_p8 = scmp.ne.s32.totalorder %s679_s0, %s452_s21  ;;  %p456_p9 = scmp.lt.u32.totalorder %s452_s21, %s679_s0 }
  0x19   :  { %p458_p10 = pnand %p456_p9, %p453_p8 }
  0x1b   :  { %461 = shalt.err (!%p458_p10)
}
  0x1c   :  { %s462_s1 = scalar_lea.vmem %s23_s16, 128  ;;  %p467_p12 = scmp.lt.s32.totalorder %s23_s16, %s23_s16 }
  0x1d   :  { %p463_p11 = scmp.ne.s32.totalorder %s23_s16, %s462_s1  ;;  %p468_p13 = scmp.lt.s32.totalorder %s462_s1, %s462_s1 }
  0x1f   :  { %p469_p0 = por %p468_p13, %p467_p12 }
  0x21   :  { %p470_p1 = pnand %p469_p0, %p463_p11 }
  0x23   :  { %473 = shalt.err (!%p470_p1)
}
  0x24   :  { %25 = dma.hbm_to_vmem [thread:$0]  %s679_s0, 128, %s23_s16, [#allocation3]  }
  0x25   :  { %s474_s30 = scalar_lea.hbm %s682_s3, 512 }
  0x26   :  { %p475_p2 = scmp.ne.s32.totalorder %s682_s3, %s474_s30  ;;  %p478_p3 = scmp.lt.u32.totalorder %s474_s30, %s682_s3 }
  0x28   :  { %p480_p4 = pnand %p478_p3, %p475_p2 }
  0x2a   :  { %483 = shalt.err (!%p480_p4)
}
  0x2b   :  { %s484_s14 = scalar_lea.vmem %s46_s18, 512  ;;  %p489_p6 = scmp.lt.s32.totalorder %s46_s18, %s46_s18 }
  0x2c   :  { %p485_p5 = scmp.ne.s32.totalorder %s46_s18, %s484_s14  ;;  %p490_p7 = scmp.lt.s32.totalorder %s484_s14, %s484_s14 }
  0x2e   :  { %p491_p8 = por %p490_p7, %p489_p6 }
  0x30   :  { %p492_p9 = pnand %p491_p8, %p485_p5 }
  0x32   :  { %495 = shalt.err (!%p492_p9)
}
  0x33   :  { %51 = dma.hbm_to_vmem [thread:$0]  %s682_s3, 512, %s46_s18, [#allocation6], %s549_s11, %s549_s11, %s550_s12  }
  0x34   :  { %s553_s16 = smov [#allocation8]   ;;  %s496_s21 = scalar_lea.hbm %s684_s5, 512 }
  0x35   :  { %s59_s17 = sshll.u32 %s553_s16, 4  ;;  %p497_p10 = scmp.ne.s32.totalorder %s684_s5, %s496_s21  ;;  %s60_s17 = int_to_ptr.vmem [resolvable:$true] %s59_s17 }
  0x36   :  { %p500_p11 = scmp.lt.u32.totalorder %s496_s21, %s684_s5 }
  0x38   :  { %p502_p12 = pnand %p500_p11, %p497_p10 }
  0x3a   :  { %505 = shalt.err (!%p502_p12)
}
  0x3b   :  { %s506_s1 = scalar_lea.vmem %s60_s17, 512  ;;  %p511_p0 = scmp.lt.s32.totalorder %s60_s17, %s60_s17 }
  0x3c   :  { %p507_p13 = scmp.ne.s32.totalorder %s60_s17, %s506_s1  ;;  %p512_p1 = scmp.lt.s32.totalorder %s506_s1, %s506_s1 }
  0x3e   :  { %p513_p2 = por %p512_p1, %p511_p0 }
  0x40   :  { %p514_p3 = pnand %p513_p2, %p507_p13 }
  0x42   :  { %517 = shalt.err (!%p514_p3)
}
  0x43   :  { %65 = dma.hbm_to_vmem [thread:$0]  %s684_s5, 512, %s60_s17, [#allocation9], %s549_s11, %s549_s11, %s550_s12  }
  0x44   :  { %540 = dma.done.wait [#allocation3], 128  }
  0x45   :  { %541 = vsyncadd [#allocation3], 4294967168 }
  0x46   :  { %542 = dma.done.wait [#allocation6], 768  }
  0x47   :  { %543 = vsyncadd [#allocation6], 4294966528 }
  0x48   :  { %544 = dma.done.wait [#allocation9], 512  }
  0x49   :  { %545 = vsyncadd [#allocation9], 4294966784  ;;  %v554_v0 = vmov 0.0|0.0   ;;  %vm555_vm0 = vmmov 0   ;;  %v556_v1 = vmov 0.0   ;;  %v81_v2 = vld [vmem:[#allocation5] sm:$0xff] }
  0x4a   :  { %405 = vmatprep.subr.bf16.mxu0 %v554_v0  ;;  %380 = vmatprep.mubr.msk.f32.mxu0 %vm555_vm0, %v556_v1  ;;  %v82_v3 = vld [vmem:[#allocation5 + $0x8] sm:$0xff]  ;;  %v167_v5 = vld [vmem:[#allocation7] sm:$0xff]  ;;  %v168_v6 = vld [vmem:[#allocation7 + $0x8] sm:$0xff]  ;;  %vm90_vm1 = vcmask 130048   ;;  %vm178_vm3 = vcmask 261120   ;;  %s557_s28 = smov [#allocation10]  }
  0x4b   :  { %408 = vmatprep.subr.bf16.mxu1 %v554_v0  ;;  %391 = vmatprep.mubr.msk.f32.mxu1 %vm555_vm0, %v556_v1  ;;  %v406_v4 = vpack.c.bf16 %v82_v3, %v81_v2  ;;  %v409_v7 = vpack.c.bf16 %v168_v6, %v167_v5  ;;  %v80_v8 = vld [vmem:[#allocation2] sm:$0xff]  ;;  %v169_v9 = vld [vmem:[#allocation7 + $0x10] sm:$0xff]  ;;  %v170_v10 = vld [vmem:[#allocation7 + $0x18] sm:$0xff]  ;;  %s346_s29 = sshll.u32 %s557_s28, 4  ;;  %s347_s29 = int_to_ptr.vmem [resolvable:$true] %s346_s29 }
  0x4c   :  { %v412_v11 = vpack.c.bf16 %v170_v10, %v169_v9  ;;  %v255_v12 = vld [vmem:[#allocation8] sm:$0xff]  ;;  %v256_v13 = vld [vmem:[#allocation8 + $0x8] sm:$0xff]  ;;  %v257_v21 = vld [vmem:[#allocation8 + $0x10] sm:$0xff]  ;;  %s518_s30 = scalar_lea.vmem %s347_s29, 128  ;;  %p523_p5 = scmp.lt.s32.totalorder %s347_s29, %s347_s29 }
  0x4d   :  { %407 = vmatpush3.bf16.msra.mxu0 %v406_v4  ;;  %410 = vmatpush3.bf16.msra.mxu1 %v409_v7  ;;  %v415_v14 = vpack.c.bf16 %v256_v13, %v255_v12  ;;  %v357_v15 = vld [vmem:[%s681_s2] ss:$0 sm:$0xff]  ;;  %v258_v22 = vld [vmem:[#allocation8 + $0x18] sm:$0xff]  ;;  %p519_p4 = scmp.ne.s32.totalorder %s347_s29, %s518_s30  ;;  %p524_p6 = scmp.lt.s32.totalorder %s518_s30, %s518_s30 }
  0x4e   :  { %414 = vmatprep.subr.bf16.mxu0 %v554_v0  ;;  %411 = vmatprep.subr.bf16.mxu1 %v554_v0  ;;  %v418_v23 = vpack.c.bf16 %v258_v22, %v257_v21  ;;  %v359_v24 = vld [vmem:[%s683_s4] ss:$0 sm:$0xff] }
  0x4f   :  { %v361_v30 = vld [vmem:[%s685_s6] ss:$0 sm:$0xff]  ;;  %p525_p7 = por %p524_p6, %p523_p5 }
  0x50   :  { %381 = vmatmul.mubr.msk.f32.vlgmr.msra.gmra.mrb[0].mxu0 %vm90_vm1, %v80_v8 }
  0x51   :  { %402 = vmatprep.mubr.msk.f32.mxu0 %vm555_vm0, %v556_v1  ;;  %413 = vmatpush3.bf16.msra.mxu1 %v412_v11  ;;  %p526_p8 = pnand %p525_p7, %p519_p4 }
  0x52   :  { %416 = vmatpush3.bf16.msra.mxu0 %v415_v14 }
  0x53   :  { %417 = vmatprep.subr.bf16.mxu0 %v554_v0 }
  0x56   :  { %419 = vmatpush3.bf16.msra.mxu0 %v418_v23 }
 0x123   :  { %v160_v16 = vpop.f32.mrb[0].mxu0 }
 0x124   :  { %v161_v17 = vadd.f32 %v357_v15, %v160_v16  ;;  %v382_v18 = vpop.f32.mrb[1].mxu0 }
 0x126   :  { %vm164_vm2 = vcmp.ge.f32.partialorder %v161_v17, 0.0  ;;  %v165_v19 = vmul.f32 0.001, %v161_v17 }
 0x128   :  { %v166_v20 = vsel %vm164_vm2, %v161_v17, %v165_v19 }
 0x129   :  { %392 = vmatmul.mubr.msk.f32.vlgmr.msra.gmra.mrb[0].mxu1 %vm178_vm3, %v166_v20 }
 0x1fc   :  { %v248_v25 = vpop.f32.mrb[0].mxu1 }
 0x1fd   :  { %v249_v26 = vadd.f32 %v359_v24, %v248_v25  ;;  %v393_v27 = vpop.f32.mrb[1].mxu1 }
 0x1ff   :  { %vm252_vm4 = vcmp.ge.f32.partialorder %v249_v26, 0.0  ;;  %v253_v28 = vmul.f32 0.001, %v249_v26 }
 0x201   :  { %v254_v29 = vsel %vm252_vm4, %v249_v26, %v253_v28 }
 0x202   :  { %403 = vmatmul.mubr.msk.f32.vlgmr.msra.gmra.mrb[2].mxu0 %vm178_vm3, %v254_v29 }
 0x2d5   :  { %v335_v31 = vpop.f32.mrb[2].mxu0 }
 0x2d6   :  { %v336_v32 = vadd.f32 %v361_v30, %v335_v31  ;;  %v404_v33 = vpop.f32.mrb[3].mxu0 }
 0x2d8   :  { %339 = vst [vmem:[#allocation10] sm:$0xff] %v336_v32 }
 0x2d9   :  { %529 = shalt.err (!%p526_p8)
}
 0x2da   :  { %s530_s9 = scalar_lea.hbm %s686_s7, 128 }
 0x2db   :  { %p531_p9 = scmp.ne.s32.totalorder %s686_s7, %s530_s9  ;;  %p534_p10 = scmp.lt.u32.totalorder %s530_s9, %s686_s7 }
 0x2dd   :  { %p536_p11 = pnand %p534_p10, %p531_p9 }
 0x2df   :  { %539 = shalt.err (!%p536_p11)
}
 0x2e0   :  { %349 = dma.vmem_to_hbm [thread:$0]  %s347_s29, 128, %s686_s7, [#allocation4]  }
 0x2e1   :  { %546 = dma.done.wait [#allocation4], 128  }
 0x2e2   :  { %547 = vsyncadd [#allocation4], 4294967168 }
 0x2e3   :  { %353 = vsyncpa [#allocation3], 1 }
 0x2e4   :  { %354 = vsyncpa [#allocation6], 1 }
 0x2e5   :  { %355 = vsyncpa [#allocation9], 1 }
 0x2e6   :  { %356 = vsyncpa [#allocation4], 1 }

</bundles_post_ra>
